<compile_context>
chip_gen: v6e
topology: v6e:2x2x1
jax: 0.10.0
libtpu: 0.0.40
codegen_flags: <defaults>
</compile_context>

<pallas_src>
import functools

import jax
import jax.numpy as jnp
from jax.experimental import pallas as pl
from jax.experimental.pallas import tpu as pltpu


def _cross_attn_kernel(x_ref, mem_ref,
                       wq_ref, wkv_ref, bq_ref, bkv_ref,
                       wo_ref, bo_ref, gamma_ref, beta_ref,
                       out_ref,
                       acc_ref,
                       *, eps: float):
    h = pl.program_id(1)
    num_heads = pl.num_programs(1)

    E = wq_ref.shape[1]           # wq_ref block: (1, E, hd)
    hd = wq_ref.shape[2]
    L = x_ref.shape[-2]
    S = mem_ref.shape[-2]

    x = x_ref[...].reshape(L, E)        # (L, E) f32 (residual kept in f32)
    mem = mem_ref[...].reshape(S, E)    # (S, E) bf16 (shipped bf16)

    # ---- this head's projections: single 2-D MXU matmuls, E-deep contraction.
    # 1/sqrt(hd) is already folded into wq / bq by the wrapper.
    q = jnp.dot(x.astype(jnp.bfloat16), wq_ref[0],
                preferred_element_type=jnp.float32) + bq_ref[0]          # (L, hd)
    kv = jnp.dot(mem, wkv_ref[0],
                 preferred_element_type=jnp.float32) + bkv_ref[0]        # (S, 2*hd)
    k = kv[:, :hd]
    v = kv[:, hd:]

    # ---- scaled-dot attention; softmax in f32.  q @ k^T via dimension_numbers
    # (no materialized transpose).
    s = jax.lax.dot_general(q.astype(jnp.bfloat16), k.astype(jnp.bfloat16),
                            dimension_numbers=(((1,), (1,)), ((), ())),
                            preferred_element_type=jnp.float32)          # (L, S)
    s = s - jnp.max(s, axis=-1, keepdims=True)
    p = jnp.exp(s)
    p = p * pl.reciprocal(jnp.sum(p, axis=-1, keepdims=True), approx=True)
    o = jnp.dot(p.astype(jnp.bfloat16), v.astype(jnp.bfloat16),
                preferred_element_type=jnp.float32)                      # (L, hd)

    # ---- this head's out_proj contribution: already a full-lane-width (L, E)
    # tile, so the accumulator store is a dense vst (no masked narrow stores).
    head_out = jnp.dot(o.astype(jnp.bfloat16), wo_ref[0],
                       preferred_element_type=jnp.float32)               # (L, E)

    @pl.when(h == 0)
    def _():
        acc_ref[...] = jnp.zeros_like(acc_ref)

    acc_ref[...] += head_out

    # ---- last head: out_proj bias + residual + LayerNorm, one dense store.
    @pl.when(h == num_heads - 1)
    def _():
        y = x + acc_ref[...] + bo_ref[...]
        mu = jnp.mean(y, axis=-1, keepdims=True)
        yc = y - mu
        var = jnp.mean(yc * yc, axis=-1, keepdims=True)
        y = yc * jax.lax.rsqrt(var + eps) * gamma_ref[...] + beta_ref[...]
        out_ref[...] = y.reshape(out_ref.shape)


def cross_attention_layer(tgt, memory, params, *, nhead: int, eps: float = 1e-5):
    """tgt: (L, N, E), memory: (S, N, E)  ->  (L, N, E)  (PyTorch seq-first)."""
    L, N, E = tgt.shape
    S, N2, E2 = memory.shape
    assert N2 == N and E2 == E and E % nhead == 0
    H, hd = nhead, E // nhead
    f32, bf16 = jnp.float32, jnp.bfloat16
    scale = 1.0 / float(hd) ** 0.5

    # ---- per-head weight slabs (tiny one-time XLA work outside the kernel);
    # leading head axis so each grid step DMAs exactly its head's slice.
    wq_h = (params["wq_t"] * scale).reshape(E, H, hd).transpose(1, 0, 2).astype(bf16)
    wkv_h = jnp.concatenate(
        [params["wk_t"].reshape(E, H, hd), params["wv_t"].reshape(E, H, hd)],
        axis=-1).transpose(1, 0, 2).astype(bf16)                        # (H, E, 2hd)
    wo_h = params["wo_t"].reshape(H, hd, E).astype(bf16)                # (H, hd, E)
    bq_h = (params["bq"] * scale).reshape(1, H, hd).transpose(1, 0, 2).astype(f32)
    bkv_h = jnp.concatenate(
        [params["bk"].reshape(1, H, hd), params["bv"].reshape(1, H, hd)],
        axis=-1).transpose(1, 0, 2).astype(f32)                         # (H, 1, 2hd)
    bo = params["bo"].astype(f32)
    gamma = params["ln_gamma"].astype(f32)
    beta = params["ln_beta"].astype(f32)

    x = tgt.astype(f32)           # residual path stays f32
    mem = memory.astype(bf16)     # K/V path: bf16 shipping halves its DMA bytes

    if E % 128 == 0 or N == 1:
        # Lane-dense per-batch column blocks of the flat (seq, N*E) views.
        # No transposes anywhere; the reshapes are free in HBM.
        x_in, m_in = x.reshape(L, N * E), mem.reshape(S, N * E)
        x_spec = pl.BlockSpec((L, E), lambda b, h: (0, b))
        m_spec = pl.BlockSpec((S, E), lambda b, h: (0, b))
        out_shape = jax.ShapeDtypeStruct((L, N * E), f32)
        out_spec = pl.BlockSpec((L, E), lambda b, h: (0, b))
        post = lambda o: o.reshape(L, N, E)
    else:
        # General-E fallback: batch-major copies made by XLA outside the kernel
        # so every block satisfies the (8,128) rule for any d_model.
        x_in = jnp.transpose(x, (1, 0, 2))        # (N, L, E)
        m_in = jnp.transpose(mem, (1, 0, 2))      # (N, S, E)
        x_spec = pl.BlockSpec((1, L, E), lambda b, h: (b, 0, 0))
        m_spec = pl.BlockSpec((1, S, E), lambda b, h: (b, 0, 0))
        out_shape = jax.ShapeDtypeStruct((N, L, E), f32)
        out_spec = pl.BlockSpec((1, L, E), lambda b, h: (b, 0, 0))
        post = lambda o: jnp.transpose(o, (1, 0, 2))

    wq_spec = pl.BlockSpec((1, E, hd), lambda b, h: (h, 0, 0))
    wkv_spec = pl.BlockSpec((1, E, 2 * hd), lambda b, h: (h, 0, 0))
    bq_spec = pl.BlockSpec((1, 1, hd), lambda b, h: (h, 0, 0))
    bkv_spec = pl.BlockSpec((1, 1, 2 * hd), lambda b, h: (h, 0, 0))
    wo_spec = pl.BlockSpec((1, hd, E), lambda b, h: (h, 0, 0))
    row_spec = pl.BlockSpec((1, E), lambda b, h: (0, 0))

    # Explicit VMEM budget from the actual tile sizes (v7x physical = 64 MiB);
    # never below the 32 MiB scoped default so small shapes behave as before.
    blk_bytes = (L * E * 4 + S * E * 2
                 + (E * hd + E * 2 * hd + hd * E) * 2
                 + (hd + 2 * hd + 3 * E) * 4
                 + 2 * L * E * 4)                    # out block + f32 accumulator
    vmem_limit = int(min(64 * 2 ** 20, max(32 * 2 ** 20, 3 * blk_bytes)))

    out = pl.pallas_call(
        functools.partial(_cross_attn_kernel, eps=eps),
        out_shape=out_shape,
        grid=(N, H),                                 # head axis innermost
        in_specs=[x_spec, m_spec, wq_spec, wkv_spec, bq_spec, bkv_spec,
                  wo_spec, row_spec, row_spec, row_spec],
        out_specs=out_spec,
        scratch_shapes=[pltpu.VMEM((L, E), jnp.float32)],
        compiler_params=pltpu.CompilerParams(
            dimension_semantics=("parallel", "arbitrary"),
            vmem_limit_bytes=vmem_limit),
    )(x_in, m_in, wq_h, wkv_h, bq_h, bkv_h, wo_h, bo, gamma, beta)

    return post(out)


def init_params(key, d_model):
    """Deterministic synthetic parameters matching nn.MultiheadAttention +
    nn.LayerNorm shapes (weights stored pre-transposed for x @ W)."""
    E = d_model
    ks = jax.random.split(key, 5)
    in_proj_w = jax.random.normal(ks[0], (3 * E, E), jnp.float32) * 0.05
    in_proj_b = jax.random.normal(ks[1], (3 * E,), jnp.float32) * 0.05
    wq, wk, wv = in_proj_w[:E], in_proj_w[E:2 * E], in_proj_w[2 * E:]
    bq, bk, bv = in_proj_b[:E], in_proj_b[E:2 * E], in_proj_b[2 * E:]
    wo = jax.random.normal(ks[2], (E, E), jnp.float32) * 0.05
    bo = jax.random.normal(ks[3], (E,), jnp.float32) * 0.05
    return {
        "wq_t": wq.T, "wk_t": wk.T, "wv_t": wv.T,
        "bq": bq.reshape(1, E), "bk": bk.reshape(1, E), "bv": bv.reshape(1, E),
        "wo_t": wo.T, "bo": bo.reshape(1, E),
        "ln_gamma": jnp.ones((1, E), jnp.float32),
        "ln_beta": jnp.zeros((1, E), jnp.float32),
    }


def _reference(tgt, memory, params, nhead, eps=1e-5):
    """Pure-JAX f32 reference of the same math (silent correctness check)."""
    L, N, E = tgt.shape
    hd = E // nhead
    x = jnp.transpose(tgt, (1, 0, 2))
    mem = jnp.transpose(memory, (1, 0, 2))
    q = x @ params["wq_t"] + params["bq"]
    k = mem @ params["wk_t"] + params["bk"]
    v = mem @ params["wv_t"] + params["bv"]
    qh = q.reshape(N, L, nhead, hd).transpose(0, 2, 1, 3) / (hd ** 0.5)
    kh = k.reshape(N, -1, nhead, hd).transpose(0, 2, 1, 3)
    vh = v.reshape(N, -1, nhead, hd).transpose(0, 2, 1, 3)
    s = jnp.einsum("bhld,bhsd->bhls", qh, kh)
    p = jax.nn.softmax(s, axis=-1)
    o = jnp.einsum("bhls,bhsd->bhld", p, vh).transpose(0, 2, 1, 3).reshape(N, L, E)
    proj = o @ params["wo_t"] + params["bo"]
    y = x + proj
    mu = y.mean(-1, keepdims=True)
    var = ((y - mu) ** 2).mean(-1, keepdims=True)
    y = (y - mu) / jnp.sqrt(var + eps) * params["ln_gamma"] + params["ln_beta"]
    return jnp.transpose(y, (1, 0, 2))


if __name__ == "__main__":
    # Config 1 exercises the lane-dense (d_model % 128 == 0) path with a 16-step
    # grid; config 2 exercises the general-d_model fallback path.
    configs = [
        (128, 4, 8, 16, 4),   # d_model, nhead, tgt_len, mem_len, batch
        (32, 4, 8, 16, 2),
    ]
    for d_model, nhead, L, S, N in configs:
        key = jax.random.PRNGKey(0)
        k_t, k_m, k_p = jax.random.split(key, 3)
        tgt = jax.random.normal(k_t, (L, N, d_model), jnp.float32)      # (L, N, E)
        memory = jax.random.normal(k_m, (S, N, d_model), jnp.float32)   # (S, N, E)
        params = init_params(k_p, d_model)

        out = cross_attention_layer(tgt, memory, params, nhead=nhead)
        out = jax.block_until_ready(out)

        ref = _reference(tgt, memory, params, nhead)
        assert out.shape == (L, N, d_model)
        # bf16 MXU operands + bf16-shipped memory + approx reciprocal ->
        # loosened tolerance vs the pure-f32 reference (inference use).
        err = float(jnp.max(jnp.abs(out - ref)))
        assert jnp.allclose(out, ref, atol=3e-2, rtol=3e-2), err

    print("KERNEL_OK")
</pallas_src>

<mosaic_0001>
module attributes {stable_mosaic.version = 11 : i64} {
  func.func @_cross_attn_kernel(%arg0: i32, %arg1: i32, %arg2: memref<8x128xf32, #tpu.memory_space<vmem>>, %arg3: memref<16x128xbf16, #tpu.memory_space<vmem>>, %arg4: memref<1x128x32xbf16, #tpu.memory_space<vmem>>, %arg5: memref<1x128x64xbf16, #tpu.memory_space<vmem>>, %arg6: memref<1x1x32xf32, #tpu.memory_space<vmem>>, %arg7: memref<1x1x64xf32, #tpu.memory_space<vmem>>, %arg8: memref<1x32x128xbf16, #tpu.memory_space<vmem>>, %arg9: memref<1x128xf32, #tpu.memory_space<vmem>>, %arg10: memref<1x128xf32, #tpu.memory_space<vmem>>, %arg11: memref<1x128xf32, #tpu.memory_space<vmem>>, %arg12: memref<8x128xf32, #tpu.memory_space<vmem>>, %arg13: memref<8x128xf32, #tpu.memory_space<vmem>>) attributes {dimension_semantics = [#tpu.dimension_semantics<parallel>, #tpu.dimension_semantics<arbitrary>], iteration_bounds = array<i64: 4, 4>, scalar_prefetch = 0 : i64, scratch_operands = 1 : i64, tpu.core_type = #tpu.core_type<tc>, window_params = [{transform_indices = @transform_0, window_bounds = array<i64: 8, 128>}, {transform_indices = @transform_1, window_bounds = array<i64: 16, 128>}, {transform_indices = @transform_2, window_bounds = array<i64: 1, 128, 32>}, {transform_indices = @transform_3, window_bounds = array<i64: 1, 128, 64>}, {transform_indices = @transform_4, window_bounds = array<i64: 1, 1, 32>}, {transform_indices = @transform_5, window_bounds = array<i64: 1, 1, 64>}, {transform_indices = @transform_6, window_bounds = array<i64: 1, 32, 128>}, {pipeline_mode = #tpu.pipeline_mode<synchronous>, transform_indices = @transform_7, window_bounds = array<i64: 1, 128>}, {pipeline_mode = #tpu.pipeline_mode<synchronous>, transform_indices = @transform_8, window_bounds = array<i64: 1, 128>}, {pipeline_mode = #tpu.pipeline_mode<synchronous>, transform_indices = @transform_9, window_bounds = array<i64: 1, 128>}, {transform_indices = @transform_10, window_bounds = array<i64: 8, 128>}]} {
    %c0 = arith.constant 0 : index
    %c0_0 = arith.constant 0 : index
    %0 = vector.load %arg2[%c0, %c0_0] : memref<8x128xf32, #tpu.memory_space<vmem>>, vector<8x128xf32>
    %c0_1 = arith.constant 0 : index
    %c0_2 = arith.constant 0 : index
    %1 = vector.load %arg3[%c0_1, %c0_2] : memref<16x128xbf16, #tpu.memory_space<vmem>>, vector<16x128xbf16>
    %2 = arith.truncf %0 : vector<8x128xf32> to vector<8x128xbf16>
    %c0_3 = arith.constant 0 : index
    %c0_4 = arith.constant 0 : index
    %c0_5 = arith.constant 0 : index
    %3 = vector.load %arg4[%c0_3, %c0_4, %c0_5] : memref<1x128x32xbf16, #tpu.memory_space<vmem>>, vector<1x128x32xbf16>
    %4 = vector.shape_cast %3 : vector<1x128x32xbf16> to vector<128x32xbf16>
    %cst = arith.constant dense<0.000000e+00> : vector<8x32xf32>
    %5 = tpu.matmul %2, %4, %cst {dimension_numbers = #tpu.dot_dimension_numbers<[1], [0], [0], [1], [0, 0, 1, 1], [], []>} : vector<8x128xbf16>, vector<128x32xbf16>, vector<8x32xf32> -> vector<8x32xf32>
    %c0_6 = arith.constant 0 : index
    %c0_7 = arith.constant 0 : index
    %c0_8 = arith.constant 0 : index
    %6 = vector.load %arg6[%c0_6, %c0_7, %c0_8] : memref<1x1x32xf32, #tpu.memory_space<vmem>>, vector<1x1x32xf32>
    %7 = vector.shape_cast %6 : vector<1x1x32xf32> to vector<1x32xf32>
    %8 = vector.broadcast %7 : vector<1x32xf32> to vector<8x32xf32>
    %9 = arith.addf %5, %8 : vector<8x32xf32>
    %c0_9 = arith.constant 0 : index
    %c0_10 = arith.constant 0 : index
    %c0_11 = arith.constant 0 : index
    %10 = vector.load %arg5[%c0_9, %c0_10, %c0_11] : memref<1x128x64xbf16, #tpu.memory_space<vmem>>, vector<1x128x64xbf16>
    %11 = vector.shape_cast %10 : vector<1x128x64xbf16> to vector<128x64xbf16>
    %cst_12 = arith.constant dense<0.000000e+00> : vector<16x64xf32>
    %12 = tpu.matmul %1, %11, %cst_12 {dimension_numbers = #tpu.dot_dimension_numbers<[1], [0], [0], [1], [0, 0, 1, 1], [], []>} : vector<16x128xbf16>, vector<128x64xbf16>, vector<16x64xf32> -> vector<16x64xf32>
    %c0_13 = arith.constant 0 : index
    %c0_14 = arith.constant 0 : index
    %c0_15 = arith.constant 0 : index
    %13 = vector.load %arg7[%c0_13, %c0_14, %c0_15] : memref<1x1x64xf32, #tpu.memory_space<vmem>>, vector<1x1x64xf32>
    %14 = vector.shape_cast %13 : vector<1x1x64xf32> to vector<1x64xf32>
    %15 = vector.broadcast %14 : vector<1x64xf32> to vector<16x64xf32>
    %16 = arith.addf %12, %15 : vector<16x64xf32>
    %17 = vector.extract_strided_slice %16 {offsets = [0, 0], sizes = [16, 32], strides = [1, 1]} : vector<16x64xf32> to vector<16x32xf32>
    %18 = vector.extract_strided_slice %16 {offsets = [0, 32], sizes = [16, 32], strides = [1, 1]} : vector<16x64xf32> to vector<16x32xf32>
    %19 = arith.truncf %9 : vector<8x32xf32> to vector<8x32xbf16>
    %20 = arith.truncf %17 : vector<16x32xf32> to vector<16x32xbf16>
    %cst_16 = arith.constant dense<0.000000e+00> : vector<8x16xf32>
    %21 = tpu.matmul %19, %20, %cst_16 {dimension_numbers = #tpu.dot_dimension_numbers<[1], [1], [0], [0], [0, 0, 1, 0], [], []>} : vector<8x32xbf16>, vector<16x32xbf16>, vector<8x16xf32> -> vector<8x16xf32>
    %cst_17 = arith.constant dense<0xFF800000> : vector<8xf32>
    %22 = vector.multi_reduction <maximumf>, %21, %cst_17 [1] : vector<8x16xf32> to vector<8xf32>
    %23 = vector.shape_cast %22 : vector<8xf32> to vector<8x1xf32>
    %24 = vector.broadcast %23 : vector<8x1xf32> to vector<8x16xf32>
    %25 = arith.subf %21, %24 : vector<8x16xf32>
    %26 = math.exp %25 : vector<8x16xf32>
    %cst_18 = arith.constant dense<0.000000e+00> : vector<8xf32>
    %27 = vector.multi_reduction <add>, %26, %cst_18 [1] : vector<8x16xf32> to vector<8xf32>
    %28 = vector.shape_cast %27 : vector<8xf32> to vector<8x1xf32>
    %29 = tpu.reciprocal %28 {approx = true} : vector<8x1xf32> -> vector<8x1xf32>
    %30 = vector.broadcast %29 : vector<8x1xf32> to vector<8x16xf32>
    %31 = arith.mulf %26, %30 : vector<8x16xf32>
    %32 = arith.truncf %31 : vector<8x16xf32> to vector<8x16xbf16>
    %33 = arith.truncf %18 : vector<16x32xf32> to vector<16x32xbf16>
    %cst_19 = arith.constant dense<0.000000e+00> : vector<8x32xf32>
    %34 = tpu.matmul %32, %33, %cst_19 {dimension_numbers = #tpu.dot_dimension_numbers<[1], [0], [0], [1], [0, 0, 1, 1], [], []>} : vector<8x16xbf16>, vector<16x32xbf16>, vector<8x32xf32> -> vector<8x32xf32>
    %35 = arith.truncf %34 : vector<8x32xf32> to vector<8x32xbf16>
    %c0_20 = arith.constant 0 : index
    %c0_21 = arith.constant 0 : index
    %c0_22 = arith.constant 0 : index
    %36 = vector.load %arg8[%c0_20, %c0_21, %c0_22] : memref<1x32x128xbf16, #tpu.memory_space<vmem>>, vector<1x32x128xbf16>
    %37 = vector.shape_cast %36 : vector<1x32x128xbf16> to vector<32x128xbf16>
    %cst_23 = arith.constant dense<0.000000e+00> : vector<8x128xf32>
    %38 = tpu.matmul %35, %37, %cst_23 {dimension_numbers = #tpu.dot_dimension_numbers<[1], [0], [0], [1], [0, 0, 1, 1], [], []>} : vector<8x32xbf16>, vector<32x128xbf16>, vector<8x128xf32> -> vector<8x128xf32>
    %c0_i32 = arith.constant 0 : i32
    %39 = arith.cmpi eq, %arg1, %c0_i32 : i32
    %40 = arith.extui %39 : i1 to i32
    %c0_i32_24 = arith.constant 0 : i32
    %41 = arith.cmpi ne, %40, %c0_i32_24 : i32
    scf.if %41 {
      %cst_30 = arith.constant 0.000000e+00 : f32
      %48 = vector.broadcast %cst_30 : f32 to vector<8x128xf32>
      %c0_31 = arith.constant 0 : index
      %c0_32 = arith.constant 0 : index
      %49 = vector.load %arg13[%c0_31, %c0_32] : memref<8x128xf32, #tpu.memory_space<vmem>>, vector<8x128xf32>
      tpu.vector_store %arg13[%c0_31, %c0_32], %48 {strides = array<i32>} : memref<8x128xf32, #tpu.memory_space<vmem>>, vector<8x128xf32>,
    } else {
    }
    %c0_25 = arith.constant 0 : index
    %c0_26 = arith.constant 0 : index
    %42 = vector.load %arg13[%c0_25, %c0_26] : memref<8x128xf32, #tpu.memory_space<vmem>>, vector<8x128xf32>
    %43 = arith.addf %42, %38 : vector<8x128xf32>
    %c0_27 = arith.constant 0 : index
    %c0_28 = arith.constant 0 : index
    %44 = vector.load %arg13[%c0_27, %c0_28] : memref<8x128xf32, #tpu.memory_space<vmem>>, vector<8x128xf32>
    tpu.vector_store %arg13[%c0_27, %c0_28], %43 {strides = array<i32>} : memref<8x128xf32, #tpu.memory_space<vmem>>, vector<8x128xf32>,
    %c3_i32 = arith.constant 3 : i32
    %45 = arith.cmpi eq, %arg1, %c3_i32 : i32
    %46 = arith.extui %45 : i1 to i32
    %c0_i32_29 = arith.constant 0 : i32
    %47 = arith.cmpi ne, %46, %c0_i32_29 : i32
    scf.if %47 {
      %c0_30 = arith.constant 0 : index
      %c0_31 = arith.constant 0 : index
      %48 = vector.load %arg13[%c0_30, %c0_31] : memref<8x128xf32, #tpu.memory_space<vmem>>, vector<8x128xf32>
      %49 = arith.addf %0, %48 : vector<8x128xf32>
      %c0_32 = arith.constant 0 : index
      %c0_33 = arith.constant 0 : index
      %50 = vector.load %arg9[%c0_32, %c0_33] : memref<1x128xf32, #tpu.memory_space<vmem>>, vector<1x128xf32>
      %51 = vector.broadcast %50 : vector<1x128xf32> to vector<8x128xf32>
      %52 = arith.addf %49, %51 : vector<8x128xf32>
      %cst_34 = arith.constant dense<0.000000e+00> : vector<8xf32>
      %53 = vector.multi_reduction <add>, %52, %cst_34 [1] : vector<8x128xf32> to vector<8xf32>
      %54 = vector.shape_cast %53 : vector<8xf32> to vector<8x1xf32>
      %cst_35 = arith.constant 1.280000e+02 : f32
      %55 = vector.broadcast %cst_35 : f32 to vector<8x1xf32>
      %56 = arith.divf %54, %55 : vector<8x1xf32>
      %57 = vector.broadcast %56 : vector<8x1xf32> to vector<8x128xf32>
      %58 = arith.subf %52, %57 : vector<8x128xf32>
      %59 = arith.mulf %58, %58 : vector<8x128xf32>
      %cst_36 = arith.constant dense<0.000000e+00> : vector<8xf32>
      %60 = vector.multi_reduction <add>, %59, %cst_36 [1] : vector<8x128xf32> to vector<8xf32>
      %61 = vector.shape_cast %60 : vector<8xf32> to vector<8x1xf32>
      %cst_37 = arith.constant 1.280000e+02 : f32
      %62 = vector.broadcast %cst_37 : f32 to vector<8x1xf32>
      %63 = arith.divf %61, %62 : vector<8x1xf32>
      %cst_38 = arith.constant 9.99999974E-6 : f32
      %64 = vector.broadcast %cst_38 : f32 to vector<8x1xf32>
      %65 = arith.addf %63, %64 : vector<8x1xf32>
      %66 = math.rsqrt %65 : vector<8x1xf32>
      %67 = vector.broadcast %66 : vector<8x1xf32> to vector<8x128xf32>
      %68 = arith.mulf %58, %67 : vector<8x128xf32>
      %c0_39 = arith.constant 0 : index
      %c0_40 = arith.constant 0 : index
      %69 = vector.load %arg10[%c0_39, %c0_40] : memref<1x128xf32, #tpu.memory_space<vmem>>, vector<1x128xf32>
      %70 = vector.broadcast %69 : vector<1x128xf32> to vector<8x128xf32>
      %71 = arith.mulf %68, %70 : vector<8x128xf32>
      %c0_41 = arith.constant 0 : index
      %c0_42 = arith.constant 0 : index
      %72 = vector.load %arg11[%c0_41, %c0_42] : memref<1x128xf32, #tpu.memory_space<vmem>>, vector<1x128xf32>
      %73 = vector.broadcast %72 : vector<1x128xf32> to vector<8x128xf32>
      %74 = arith.addf %71, %73 : vector<8x128xf32>
      %c0_43 = arith.constant 0 : index
      %c0_44 = arith.constant 0 : index
      %75 = vector.load %arg12[%c0_43, %c0_44] : memref<8x128xf32, #tpu.memory_space<vmem>>, vector<8x128xf32>
      tpu.vector_store %arg12[%c0_43, %c0_44], %74 {strides = array<i32>} : memref<8x128xf32, #tpu.memory_space<vmem>>, vector<8x128xf32>,
    } else {
    }
    return
  }
  func.func @transform_0(%arg0: i32, %arg1: i32) -> (i32, i32) {
    %c0_i32 = arith.constant 0 : i32
    %c0_i32_0 = arith.constant 0 : i32
    return %c0_i32, %arg0 : i32, i32
  }
  func.func @transform_1(%arg0: i32, %arg1: i32) -> (i32, i32) {
    %c0_i32 = arith.constant 0 : i32
    %c0_i32_0 = arith.constant 0 : i32
    return %c0_i32, %arg0 : i32, i32
  }
  func.func @transform_2(%arg0: i32, %arg1: i32) -> (i32, i32, i32) {
    %c0_i32 = arith.constant 0 : i32
    %c0_i32_0 = arith.constant 0 : i32
    %c0_i32_1 = arith.constant 0 : i32
    return %arg1, %c0_i32, %c0_i32_0 : i32, i32, i32
  }
  func.func @transform_3(%arg0: i32, %arg1: i32) -> (i32, i32, i32) {
    %c0_i32 = arith.constant 0 : i32
    %c0_i32_0 = arith.constant 0 : i32
    %c0_i32_1 = arith.constant 0 : i32
    return %arg1, %c0_i32, %c0_i32_0 : i32, i32, i32
  }
  func.func @transform_4(%arg0: i32, %arg1: i32) -> (i32, i32, i32) {
    %c0_i32 = arith.constant 0 : i32
    %c0_i32_0 = arith.constant 0 : i32
    %c0_i32_1 = arith.constant 0 : i32
    return %arg1, %c0_i32, %c0_i32_0 : i32, i32, i32
  }
  func.func @transform_5(%arg0: i32, %arg1: i32) -> (i32, i32, i32) {
    %c0_i32 = arith.constant 0 : i32
    %c0_i32_0 = arith.constant 0 : i32
    %c0_i32_1 = arith.constant 0 : i32
    return %arg1, %c0_i32, %c0_i32_0 : i32, i32, i32
  }
  func.func @transform_6(%arg0: i32, %arg1: i32) -> (i32, i32, i32) {
    %c0_i32 = arith.constant 0 : i32
    %c0_i32_0 = arith.constant 0 : i32
    %c0_i32_1 = arith.constant 0 : i32
    return %arg1, %c0_i32, %c0_i32_0 : i32, i32, i32
  }
  func.func @transform_7(%arg0: i32, %arg1: i32) -> (i32, i32) {
    %c0_i32 = arith.constant 0 : i32
    %c0_i32_0 = arith.constant 0 : i32
    %c0_i32_1 = arith.constant 0 : i32
    return %c0_i32, %c0_i32_0 : i32, i32
  }
  func.func @transform_8(%arg0: i32, %arg1: i32) -> (i32, i32) {
    %c0_i32 = arith.constant 0 : i32
    %c0_i32_0 = arith.constant 0 : i32
    %c0_i32_1 = arith.constant 0 : i32
    return %c0_i32, %c0_i32_0 : i32, i32
  }
  func.func @transform_9(%arg0: i32, %arg1: i32) -> (i32, i32) {
    %c0_i32 = arith.constant 0 : i32
    %c0_i32_0 = arith.constant 0 : i32
    %c0_i32_1 = arith.constant 0 : i32
    return %c0_i32, %c0_i32_0 : i32, i32
  }
  func.func @transform_10(%arg0: i32, %arg1: i32) -> (i32, i32) {
    %c0_i32 = arith.constant 0 : i32
    %c0_i32_0 = arith.constant 0 : i32
    return %c0_i32, %arg0 : i32, i32
  }
}

</mosaic_0001>

<bundles_post_ra>
// kernel: tpu_custom_call.1
= control target key start
LH: loop header
LB: loop body
LE: loop exit
PB: predicated region body
PF: predicated region fallthrough
CT: control target
= control target key end

     0   :  { %s1764_s0 = inlined_call_operand.vmem [shape: f32[8,512], index: 0, kind: input, shape index: {}]   ;;  %s1765_s1 = inlined_call_operand.vmem [shape: bf16[16,512], index: 1, kind: input, shape index: {}]   ;;  %s1766_s2 = inlined_call_operand.vmem [shape: bf16[4,128,32], index: 2, kind: input, shape index: {}]   ;;  %s1767_s3 = inlined_call_operand.vmem [shape: bf16[4,128,64], index: 3, kind: input, shape index: {}]   ;;  %s1768_s4 = inlined_call_operand.vmem [shape: f32[4,1,32], index: 4, kind: input, shape index: {}]   ;;  %s1769_s5 = inlined_call_operand.vmem [shape: f32[4,1,64], index: 5, kind: input, shape index: {}]   ;;  %s1770_s6 = inlined_call_operand.vmem [shape: bf16[4,32,128], index: 6, kind: input, shape index: {}]   ;;  %s1771_s7 = inlined_call_operand.vmem [shape: f32[1,128], index: 7, kind: input, shape index: {}]   ;;  %s1772_s8 = inlined_call_operand.vmem [shape: f32[1,128], index: 8, kind: input, shape index: {}]   ;;  %s1773_s9 = inlined_call_operand.vmem [shape: f32[1,128], index: 9, kind: input, shape index: {}]   ;;  %s1774_s10 = inlined_call_operand.hbm [shape: f32[8,512], index: 10, kind: output, shape index: {}]  }
   0x1   :  { %1777 = sst [smem:[#allocation9_spill]] %s1764_s0 }
   0x2   :  { %1778 = sst [smem:[#allocation10_spill]] %s1765_s1 }
   0x3   :  { %1779 = sst [smem:[#allocation11_spill]] %s1766_s2 }
   0x4   :  { %15 = vsyncpa [#allocation5], 0 }
   0x5   :  { %17 = vsyncpa [#allocation5 + $0x1], 0  ;;  %s1523_s13 = smov 0   ;;  %s1525_s14 = smov 0  }
   0x6   :  { %s1527_s15 = smov 0   ;;  %s1529_s16 = smov 0  }
   0x7   :  { %s1531_s17 = smov 0   ;;  %s1533_s18 = smov 0  }
   0x8   :  { %s1535_s19 = smov 0   ;;  %s1537_s20 = smov 0  }
   0x9 LB: > { %1780 = sst [smem:[#allocation7_spill]] %s1453_s18  ;;  %s1132_s21 = sadd.s32 4294967295, %s1461_s20   ;;  %s1461_s20 = sphi %s1537_s20, %s23_s20   ;;  %s1457_s19 = sphi %s1535_s19, %s1795_s19   ;;  %s1453_s18 = sphi %s1533_s18, %s1790_s18   ;;  %s1449_s17 = sphi %s1531_s17, %s1794_s17   ;;  %s1445_s16 = sphi %s1529_s16, %s1789_s16   ;;  %s1441_s15 = sphi %s1527_s15, %s1793_s15   ;;  %s1437_s14 = sphi %s1525_s14, %s1792_s14   ;;  %s1433_s13 = sphi %s1523_s13, %s1791_s13  }
   0xa   : > { %s1133_s22 = sadd.s32 4294967294, %s1461_s20   ;;  %s32_s23 = sadd.s32 1, %s1453_s18 }
   0xb   : > { %p33_p0 = scmp.ge.s32.totalorder %s32_s23, 4  ;;  %s35_s24 = sadd.s32 1, %s1457_s19 }
   0xc   : > { %p75_p1 = scmp.ne.s32.totalorder %s1441_s15, %s1437_s14  ;;  %p76_p2 = scmp.eq.s32.totalorder %s1461_s20, 0 }
   0xd   : > { %s1797_s23 = smov (%p33_p0, %s32_s23), 0  ;;  %s1799_s24 = smov (!%p33_p0, %s35_s24), %s1457_s19 }
   0xe   : > { %1781 = sst [smem:[#allocation8_spill]] %s1797_s23  ;;  %p1573_p3 = por %p76_p2, %p75_p1 }
   0xf   : > { %p298_p4 = scmp.eq.s32.totalorder %s1132_s21, 15  ;;  %p37_p5 = scmp.ge.s32.totalorder %s1799_s24, 4 }
  0x10   : > { %p303_p6 = scmp.ne.s32.totalorder %s1437_s14, %s1433_s13  ;;  %p304_p8 = scmp.eq.s32.totalorder %s1133_s22, 15 }
  0x11   : > { %p1579_p7 = por %p298_p4, %p75_p1  ;;  %s1801_s24 = smov (%p37_p5, %s1799_s24), 0 }
  0x12   : > { %p1585_p9 = por %p304_p8, %p303_p6  ;;  %s65_s28 = ssub.s32 %s1457_s19, %s1801_s24 }
  0x13   : > { %s68_s29 = sadd.s32 1, %s1441_s15  ;;  %p66_p10 = scmp.eq.s32.totalorder %s65_s28, 0 }
  0x14   : > { %p1135_p11 = scmp.ge.s32.totalorder %s1461_s20, 16 }
  0x15   : > { %s1593_s30 = scalar_select %p66_p10, %s1441_s15, %s68_s29  }
  0x16   : > { %329 = sbr.rel (%p1135_p11) target bundleno = 38 (0x26), region = 28 }
  0x1b   : > { %339 = sbr.rel (!%p1573_p3) target bundleno = 38 (0x26), region = 36  ;;  %s341_s11 = sand.u32 (%p1573_p3), 1, %s1441_s15  }
  0x1c   : > { %s1137_s12 = sshll.u32 (%p1573_p3), %s1457_s19, 2  ;;  %s1136_s21 = sshll.u32 (%p1573_p3), %s341_s11, 3 }
  0x1d   : > { %s1785_s1 = sld [smem:[#allocation10_spill]] (%p1573_p3)  ;;  %s343_s28 = scalar_lea.vmem (%p1573_p3), [#allocation3], %s1136_s21 }
  0x23   : > { %s345_s18 = scalar_lea.vmem %s1785_s1, %s1137_s12 }
  0x24   : > { %v362_v0 = vld [vmem:[%s345_s18] sm:$0xf]  ;;  %v364_v1 = vld [vmem:[%s345_s18 + $0x10] sm:$0xf] }
  0x25   : > { %363 = vst [vmem:[%s343_s28] sm:$0xf] %v362_v0  ;;  %365 = vst [vmem:[%s343_s28 + $0x4] sm:$0xf] %v364_v1 }
  0x26 PF: > { %p1138_p12 = scmp.ge.s32.totalorder %s1461_s20, 1  ;;  %p428_p13 = scmp.lt.s32.totalorder %s1461_s20, 17 }
  0x28   : > { %p429_p0 = pnand %p1138_p12, %p428_p13 }
  0x29   : > { %p501_p1 = scmp.lt.s32.totalorder (!%p429_p0), %s1445_s16, 3  ;;  %s1776_s23 = sand.u32 (!%p429_p0), 1, %s1437_s14  }
  0x2a   : > { %432 = sbr.rel (%p429_p0) target bundleno = 1547 (0x60b), region = 97  ;;  %s1611_s18 = sshll.u32 (!%p429_p0), %s1776_s23, 3 }
  0x2b   : > { %s437_s11 = scalar_lea.vmem (!%p429_p0), [#allocation3], %s1611_s18  ;;  %s1786_s2 = sld [smem:[#allocation11_spill]] (!%p429_p0) }
  0x2c   : > { %p497_p2 = scmp.lt.s32.totalorder (!%p429_p0), %s1449_s17, 3  ;;  %s1787_s0 = sld [smem:[#allocation9_spill]] (!%p429_p0) }
  0x2d   : > { %s1465_s21 = smov (!%p429_p0), 96   ;;  %p1172_p3 = scmp.ne.s32.totalorder (!%p429_p0), %s1445_s16, 0 }
  0x2f   : > { %v1463_v2 = vmov 0.0   ;;  %s1614_s25 = scalar_select %p501_p1, %s1445_s16, 3  ;;  %vm1464_vm0 = vmmov 0   ;;  %v1359_v20 = vld [vmem:[%s437_s11] sm:$0xff]   ;;  %vm758_vm1 = vcmask 261120   ;;  %vm805_vm2 = vcmask 130048  }
  0x30   : > { %1229 = vmatprep.subr.bf16.mxu1 %v1463_v2  ;;  %1209 = vmatprep.subr.bf16.mxu0 %v1463_v2  ;;  %s498_s23 = scalar_select %p497_p2, %s1449_s17, 3 }
  0x31   : > { %1245 = vmatprep.mubr.msk.bf16.mxu1 %vm1464_vm0, %v1463_v2  ;;  %1225 = vmatprep.mubr.msk.bf16.mxu0 %vm1464_vm0, %v1463_v2  ;;  %s1181_s29 = sshll.u32 %s1614_s25, 6  ;;  %s513_s12 = scalar_lea.vmem %s1768_s4, %s1614_s25 }
  0x32   : > { %s1625_s22 = scalar_lea.vmem %s1767_s3, %s1181_s29  ;;  %s1630_s1 = scalar_lea.vmem %s1786_s2, %s1181_s29  ;;  %v1148_v31 = vld [vmem:[%s513_s12] ss:$0 sm:$0xff] }
  0x33   : > { %v1344_v3 = vld [vmem:[%s1625_s22 + $0x38] sm:$0xff]   ;;  %v1345_v4 = vld [vmem:[%s1625_s22 + $0x30] sm:$0xff]   ;;  %v1347_v7 = vld [vmem:[%s1625_s22 + $0x28] sm:$0xff]   ;;  %s1141_s29 = sshll.u32 %s498_s23, 3 }
  0x34   : > { %1230 = vmatpush3.bf16.msra.mxu1 %v1344_v3  ;;  %v1346_v5 = vld [vmem:[%s1630_s1 + $0x38] sm:$0xff]   ;;  %v1348_v6 = vld [vmem:[%s1630_s1 + $0x30] sm:$0xff]   ;;  %v1350_v8 = vld [vmem:[%s1630_s1 + $0x28] sm:$0xff]   ;;  %s500_s28 = scalar_lea.vmem %s1787_s0, %s1141_s29 }
  0x35   : > { %1231 = vmatprep.subr.bf16.mxu1 %v1463_v2  ;;  %1210 = vmatpush3.bf16.msra.mxu0 %v1346_v5  ;;  %v1349_v9 = vld [vmem:[%s1625_s22 + $0x20] sm:$0xff]   ;;  %v1351_v11 = vld [vmem:[%s1625_s22 + $0x18] sm:$0xff]   ;;  %v1353_v13 = vld [vmem:[%s1625_s22 + $0x10] sm:$0xff]  }
  0x36   : > { %1211 = vmatprep.subr.bf16.mxu0 %v1463_v2  ;;  %v1352_v10 = vld [vmem:[%s1630_s1 + $0x20] sm:$0xff]   ;;  %v1354_v12 = vld [vmem:[%s1630_s1 + $0x18] sm:$0xff]   ;;  %v1356_v14 = vld [vmem:[%s1630_s1 + $0x10] sm:$0xff]  }
  0x37   : > { %v1355_v15 = vld [vmem:[%s1625_s22 + $0x8] sm:$0xff]   ;;  %v1357_v17 = vld [vmem:[%s1625_s22] sm:$0xff]   ;;  %s516_s22 = scalar_lea.vmem %s1769_s5, %s1614_s25 }
  0x38   : > { %1232 = vmatpush3.bf16.msra.mxu1 %v1345_v4  ;;  %v1358_v16 = vld [vmem:[%s1630_s1 + $0x8] sm:$0xff]   ;;  %v1360_v18 = vld [vmem:[%s1630_s1] sm:$0xff]  }
  0x39   : > { %1233 = vmatprep.subr.bf16.mxu1 %v1463_v2  ;;  %1212 = vmatpush3.bf16.msra.mxu0 %v1348_v6  ;;  %v1666_v19 = vld [vmem:[%s500_s28] sm:$0xff]  ;;  %s1183_s28 = sshll.u32 %s1614_s25, 4  ;;  %s496_s25 = scalar_lea.vmem [#allocation4], %s1611_s18 }
  0x3a   : > { %1213 = vmatprep.subr.bf16.mxu0 %v1463_v2  ;;  %v526_v21 = vpack.c.bf16 %v1666_v19, %v1666_v19  ;;  %v1157_v23 = vld [vmem:[%s516_s22] ss:$0 sm:$0xff]  ;;  %s521_s22 = scalar_lea.vmem %s1770_s6, %s1183_s28 }
  0x3b   : > { %v1361_v49 = vld [vmem:[%s521_s22 + $0x8] sm:$0xff]   ;;  %v1362_v54 = vld [vmem:[%s521_s22] sm:$0xff]  }
  0x3c   : > { %1234 = vmatpush3.bf16.msra.mxu1 %v1347_v7 }
  0x3d   : > { %1235 = vmatprep.subr.bf16.mxu1 %v1463_v2  ;;  %1214 = vmatpush3.bf16.msra.mxu0 %v1350_v8 }
  0x3e   : > { %1215 = vmatprep.subr.bf16.mxu0 %v1463_v2 }
  0x40   : > { %1236 = vmatpush3.bf16.msra.mxu1 %v1349_v9 }
  0x41   : > { %1237 = vmatprep.subr.bf16.mxu1 %v1463_v2  ;;  %1216 = vmatpush3.bf16.msra.mxu0 %v1352_v10 }
  0x42   : > { %1217 = vmatprep.subr.bf16.mxu0 %v1463_v2 }
  0x44   : > { %1238 = vmatpush3.bf16.msra.mxu1 %v1351_v11 }
  0x45   : > { %1239 = vmatprep.subr.bf16.mxu1 %v1463_v2  ;;  %1218 = vmatpush3.bf16.msra.mxu0 %v1354_v12 }
  0x46   : > { %1219 = vmatprep.subr.bf16.mxu0 %v1463_v2 }
  0x48   : > { %1240 = vmatpush3.bf16.msra.mxu1 %v1353_v13 }
  0x49   : > { %1241 = vmatprep.subr.bf16.mxu1 %v1463_v2  ;;  %1220 = vmatpush3.bf16.msra.mxu0 %v1356_v14 }
  0x4a   : > { %1221 = vmatprep.subr.bf16.mxu0 %v1463_v2 }
  0x4c   : > { %1242 = vmatpush3.bf16.msra.mxu1 %v1355_v15 }
  0x4d   : > { %1243 = vmatprep.subr.bf16.mxu1 %v1463_v2  ;;  %1222 = vmatpush3.bf16.msra.mxu0 %v1358_v16 }
  0x4e   : > { %1223 = vmatprep.subr.bf16.mxu0 %v1463_v2 }
  0x50   : > { %1244 = vmatpush3.bf16.msra.mxu1 %v1357_v17 }
  0x51   : > { %1255 = vmatprep.subr.bf16.mxu1 %v1463_v2  ;;  %1224 = vmatpush3.bf16.msra.mxu0 %v1360_v18 }
  0x52   : > { %1249 = vmatprep.subr.bf16.mxu0 %v1463_v2 }
  0x53   : > { %1246 = vmatmul.mubr.bf16.vlgmr.msra.gmra.mxu1 %v1359_v20 }
  0x54   : > { %1257 = vmatprep.mubr.msk.bf16.mxu1 %vm1464_vm0, %v1463_v2  ;;  %1226 = vmatmul.mubr.bf16.vlgmr.msra.gmra.mxu0 %v526_v21 }
  0x55   : > { %1251 = vmatprep.mubr.msk.bf16.mxu0 %vm1464_vm0, %v1463_v2 }
 0x113   : > { %v749_v22 = vpop.f32.mrf.mxu1 }
 0x114   : > { %v632_v25 = vpop.f32.mrf.mxu0  ;;  %v750_v28 = vadd.f32 %v1157_v23, %v749_v22 }
 0x115   : > { %v1247_v24 = vpop.f32.mrf.mxu1  ;;  %v633_v35 = vadd.f32 %v1148_v31, %v632_v25 }
 0x116   : > { %v1227_v27 = vpop.f32.mrf.mxu0 }
 0x117   : > { %v752_v26 = vpop.f32.mrf.mxu1  ;;  %v756_v37 = vpack.c.bf16 %v633_v35, %v633_v35 }
 0x118   : > { %v753_v29 = vadd.f32 %v1157_v23, %v752_v26  ;;  %v635_v32 = vpop.f32.mrf.mxu0 }
 0x119   : > { %v1248_v30 = vpop.f32.mrf.mxu1 }
 0x11a   : > { %v757_v33 = vpack.c.bf16 %v753_v29, %v750_v28  ;;  %v1228_v34 = vpop.f32.mrf.mxu0 }
 0x11c   : > { %819 = vrot.lane.b32.xlu1 %v757_v33, %s1465_s21  ;;  %v763_v36 = vsel %vm758_vm1, %v757_v33, 0 }
 0x11d   : > { %1250 = vmatpush3.bf16.xpose.msra.mxu0 %v763_v36 }
 0x11e   : > { %1261 = vmatprep.subr.bf16.mxu0 %v1463_v2 }
 0x124   : > { %1252 = vmatmul.mubr.msk.bf16.vlgmr.msra.gmra.mxu0 %vm758_vm1, %v756_v37 }
 0x125   : > { %1265 = vmatprep.mubr.msk.bf16.mxu0 %vm1464_vm0, %v1463_v2  ;;  %1262 = vmatpush3.bf16.msra.mxu0 %v1361_v49 }
 0x126   : > { %1263 = vmatprep.subr.bf16.mxu0 %v1463_v2 }
 0x129   : > { %1264 = vmatpush3.bf16.msra.mxu0 %v1362_v54 }
 0x18e   : > { %v820_v38 = vpop.permute.xlu1 %819 }
 0x18f   : > { %1256 = vmatpush3.bf16.msra.mxu1 %v820_v38 }
 0x1e4   : > { %v799_v39 = vpop.f32.mrf.mxu0 }
 0x1e5   : > { %v806_v40 = vsel %vm805_vm2, %v799_v39, -inf }
 0x1e6   : > { %807 = vmax.xlane.f32.xlu0 %v806_v40  ;;  %v1253_v41 = vpop.f32.mrf.mxu0 }
 0x1e8   : > { %v802_v42 = vpop.f32.mrf.mxu0 }
 0x1ea   : > { %v1254_v43 = vpop.f32.mrf.mxu0 }
 0x26f   : > { %v808_v44 = vpop.xlane.xlu0 %807 }
 0x270   : > { %v809_v45 = vsub.f32 %v799_v39, %v808_v44 }
 0x272   : > { %v810_v46 = vmul.f32 1.442695, %v809_v45 }
 0x274   : > { %1363 = vpow2.f32 %v810_v46 }
 0x281   : > { %v1364_v47 = vpop.eup %1363 }
 0x282   : > { %v812_v48 = vsel %vm805_vm2, %v1364_v47, 0.0 }
 0x283   : > { %813 = vadd.xlane.f32.xlu0 %v812_v48 }
 0x30c   : > { %v814_v50 = vpop.xlane.xlu0 %813 }
 0x30d   : > { %1365 = vrcp.f32 %v814_v50 }
 0x31a   : > { %v1366_v51 = vpop.eup %1365 }
 0x31b   : > { %v816_v52 = vmul.f32 %v1366_v51, %v1364_v47 }
 0x31d   : > { %v817_v53 = vpack.c.bf16 %v816_v52, %v816_v52 }
 0x31f   : > { %1258 = vmatmul.mubr.msk.bf16.vlgmr.msra.gmra.mxu1 %vm805_vm2, %v817_v53 }
 0x3df   : > { %v859_v55 = vpop.f32.mrf.mxu1 }
 0x3e0   : > { %v865_v56 = vpack.c.bf16 %v859_v55, %v859_v55 }
 0x3e1   : > { %v1259_v57 = vpop.f32.mrf.mxu1 }
 0x3e2   : > { %1266 = vmatmul.mubr.msk.bf16.vlgmr.msra.gmra.mxu0 %vm758_vm1, %v865_v56 }
 0x3e3   : > { %v862_v58 = vpop.f32.mrf.mxu1 }
 0x3e5   : > { %v1260_v59 = vpop.f32.mrf.mxu1 }
 0x4a2   : > { %v919_v60 = vpop.f32.mrf.mxu0 }
 0x4a4   : > { %v1267_v61 = vpop.f32.mrf.mxu0  ;;  %928 = sbr.rel (%p1172_p3) target bundleno = 1195 (0x4ab), region = 105 }
 0x4a6   : > { %v922_v62 = vpop.f32.mrf.mxu0 }
 0x4a8   : > { %v1268_v63 = vpop.f32.mrf.mxu0 }
 0x4a9   : > { %v1466_v0 = vmov 0.0  }
 0x4aa   : > { %929 = vst [vmem:[#allocation2] sm:$0xff] %v1466_v0 }
 0x4ab PF: > { %p1173_p4 = scmp.ne.s32.totalorder %s1445_s16, 3 }
 0x4b0   : > { %936 = sbr.rel (%p1173_p4) target bundleno = 1523 (0x5f3), region = 109 }
 0x4b1   : > { %v930_v1 = vld [vmem:[#allocation2] sm:$0xff] }
 0x4b2   : > { %v931_v2 = vadd.f32 %v930_v1, %v919_v60 }
 0x4b4   : > { %932 = vst [vmem:[#allocation2] sm:$0xff] %v931_v2 }
 0x4b5   : > { %v1174_v4 = vld [vmem:[%s1771_s7] ss:$0 sm:$0xff] }
 0x4b6   : > { %v1175_v15 = vld [vmem:[%s1772_s8] ss:$0 sm:$0xff] }
 0x4b7   : > { %v1176_v17 = vld [vmem:[%s1773_s9] ss:$0 sm:$0xff] }
 0x4bb   : > { %v937_v3 = vld [vmem:[#allocation2] sm:$0xff] }
 0x4bc   : > { %v938_v5 = vadd.f32 %v937_v3, %v1666_v19 }
 0x4be   : > { %v946_v6 = vadd.f32 %v1174_v4, %v938_v5 }
 0x4c0   : > { %947 = vadd.xlane.f32.xlu0 %v946_v6 }
 0x549   : > { %v948_v7 = vpop.xlane.xlu0 %947 }
 0x54a   : > { %v950_v8 = vmul.f32 0.0078125, %v948_v7 }
 0x54c   : > { %v951_v9 = vsub.f32 %v946_v6, %v950_v8 }
 0x54e   : > { %v952_v10 = vmul.f32 %v951_v9, %v951_v9 }
 0x550   : > { %953 = vadd.xlane.f32.xlu0 %v952_v10 }
 0x5d9   : > { %v954_v11 = vpop.xlane.xlu0 %953 }
 0x5da   : > { %v955_v12 = vmul.f32 0.0078125, %v954_v11 }
 0x5dc   : > { %v956_v13 = vadd.f32 1e-05, %v955_v12 }
 0x5de   : > { %1367 = vrsqrt.f32 %v956_v13 }
 0x5eb   : > { %v1368_v14 = vpop.eup %1367 }
 0x5ec   : > { %v958_v16 = vmul.f32 %v1368_v14, %v951_v9 }
 0x5ee   : > { %v966_v18 = vmul.f32 %v1175_v15, %v958_v16 }
 0x5f0   : > { %v974_v19 = vadd.f32 %v1176_v17, %v966_v18 }
 0x5f2   : > { %975 = vst [vmem:[%s496_s25] sm:$0xff] %v974_v19 }
 0x5f3 PF: > { %s1178_s1 = sshll.u32 %s1449_s17, 7  ;;  %s990_s29 = sshll.u32 %s496_s25, 4  ;;  %s991_s29 = int_to_ptr.vmem [resolvable:$true] %s990_s29 }
 0x5f4   : > { %s988_s23 = scalar_lea.hbm %s1774_s10, %s1178_s1  ;;  %s1788_s16 = sand.u32 1, %s1437_s14  }
 0x5f5   : > { %s977_s12 = scalar_lea.sflag [#allocation5], %s1788_s16  ;;  %s1369_s21 = scalar_lea.vmem %s991_s29, 128 }
 0x5f6   : > { %p1370_p5 = scmp.ne.s32.totalorder %s991_s29, %s1369_s21  ;;  %s1467_s28 = smov [#allocation4]  }
 0x5f7   : > { %s1373_s0 = sshll.u32 %s1467_s28, 4  ;;  %s1374_s0 = int_to_ptr.vmem [resolvable:$false] %s1373_s0 }
 0x5f8   : > { %p1371_p6 = pnand %p1370_p5, %p1579_p7  ;;  %s1375_s2 = scalar_lea.vmem %s1374_s0, 256 }
 0x5f9   : > { %p1376_p10 = scmp.lt.s32.totalorder %s991_s29, %s1374_s0  ;;  %p1377_p11 = scmp.lt.s32.totalorder %s1375_s2, %s1369_s21 }
 0x5fa   : > { %p1372_p8 = pneg %p1371_p6 }
 0x5fb   : > { %p1378_p12 = por %p1377_p11, %p1376_p10 }
 0x5fd   : > { %p1379_p13 = pnand %p1378_p12, %p1372_p8 }
 0x5ff   : > { %1382 = shalt.err (!%p1379_p13)
}
 0x600   : > { %s1383_s17 = scalar_lea.hbm %s988_s23, 128  ;;  %s1387_s1 = scalar_lea.hbm %s1774_s10, 512 }
 0x601   : > { %p1384_p0 = scmp.ne.s32.totalorder %s988_s23, %s1383_s17  ;;  %p1388_p3 = scmp.lt.s32.totalorder %s988_s23, %s1774_s10 }
 0x602   : > { %p1389_p4 = scmp.lt.s32.totalorder %s1387_s1, %s1383_s17 }
 0x603   : > { %p1385_p1 = pnand %p1384_p0, %p1579_p7 }
 0x604   : > { %p1390_p5 = por %p1389_p4, %p1388_p3 }
 0x605   : > { %p1386_p2 = pneg %p1385_p1 }
 0x607   : > { %p1391_p6 = pnand %p1390_p5, %p1386_p2 }
 0x609   : > { %1394 = shalt.err (!%p1391_p6)
}
 0x60a   : > { %1269 = dma.vmem_to_hbm [thread:$0]  (%p1579_p7), %s991_s29, 128, %s988_s23, %s977_s12  }
 0x60b PF: > { %p1275_p8 = scmp.ge.s32.totalorder %s1461_s20, 2  ;;  %s1002_s0 = sand.u32 1, %s1433_s13  }
 0x60c   : > { %s1003_s2 = scalar_lea.sflag [#allocation5], %s1002_s0 }
 0x60d   : > { %p1272_p10 = pnand %p1275_p8, %p1585_p9 }
 0x60f   : > { %p1273_p11 = pneg %p1272_p10 }
 0x611   : > { %1428 = dma.done.wait (%p1273_p11), %s1003_s2, 128  }
 0x612   : > { %1430 = vsyncadd (%p1273_p11), %s1003_s2, 4294967168  ;;  %s23_s20 = sadd.s32 1, %s1461_s20   ;;  %s1789_s16 = sld [smem:[#allocation7_spill]] }
 0x613   : > { %p20_p12 = scmp.ge.s32.totalorder %s23_s20, 18   ;;  %s1790_s18 = sld [smem:[#allocation8_spill]] }
 0x614   : > { %s1791_s13 = smov %s1437_s14  ;;  %s1792_s14 = smov %s1441_s15 }
 0x615   : > { %s1793_s15 = smov %s1593_s30  ;;  %s1794_s17 = smov %s1457_s19 }
 0x616   : > { %s1795_s19 = smov %s1801_s24  ;;  %22 = sbr.rel (!%p20_p12) target bundleno = 9 (0x9), region = 167 }
 0x61b   :  { %1008 = vsyncpa [#allocation5], 1 }
 0x61c   :  { %1010 = vsyncpa [#allocation5 + $0x1], 1 }

</bundles_post_ra>
